<compile_context>
chip_gen: v7x
topology: tpu7x:2x2x1
jax: 0.10.0
libtpu: 0.0.40
codegen_flags: <defaults>
</compile_context>

<pallas_src>
import jax
import jax.numpy as jnp
from jax.experimental import pallas as pl
from jax.experimental.pallas import tpu as pltpu


def _round_up(x, m):
    return ((x + m - 1) // m) * m


def seq_attn_kernel(q_ref, k_ref, wt_ref, b_ref, out_ref):
    """One batch-tile of SeqAttn.

    q_ref  : (bb, Q)     query tile
    k_ref  : (bb, S, K)  key tile (unpadded)
    wt_ref : (Q, K)      Linear weight, pre-transposed on the host
    b_ref  : (1, K)      Linear bias
    out_ref: (bb, S)     softmax over seq
    """
    # Linear: Wquery = query @ W^T + b -> (bb, K).  Weight is transposed
    # host-side, so this is a direct MXU matmul (no in-kernel transpose).
    wq = jnp.dot(q_ref[...], wt_ref[...], preferred_element_type=jnp.float32)
    wq = wq + b_ref[...].astype(jnp.float32)

    # scores[b, s] = sum_k Wquery[b, k] * key[b, s, k]
    # MXU contraction in the proven flash-attention 'bqk,bsk->bqs' form
    # (q == 1), accumulated in f32.  wq is cast to the key dtype so a bf16
    # key path stays a single-dtype MXU op.
    wq3 = wq[:, None, :].astype(k_ref.dtype)                    # (bb, 1, K)
    s3 = jnp.einsum("bqk,bsk->bqs", wq3, k_ref[...],
                    preferred_element_type=jnp.float32)         # (bb, 1, S)
    scores = s3[:, 0, :]                                        # (bb, S)

    # Numerically-stable softmax over seq, all f32, EXACT normalization so
    # rows sum to 1 to float precision.
    m = jnp.max(scores, axis=-1, keepdims=True)
    e = jnp.exp(scores - m)
    denom = jnp.sum(e, axis=-1, keepdims=True)
    out_ref[...] = (e / denom).astype(out_ref.dtype)


# Conservative scoped-VMEM budget that is valid on every generation
# (v7x has only 64 MiB physical VMEM; v5e/v6e have 128 MiB).
_DEFAULT_VMEM_LIMIT = 48 * 1024 * 1024


def _choose_block_b(B, S, K, key_elem_bytes, vmem_limit_bytes):
    """Pick a batch tile: big enough to hide per-step overhead, small enough
    that the double-buffered key tile fits comfortably in scoped VMEM, and
    leaving >= 2 grid steps so both v7x TensorCores get work."""
    if B <= 8:
        return B
    budget = vmem_limit_bytes // 3                       # ~1/3 of VMEM for key
    per_row = 2 * S * _round_up(K, 128) * key_elem_bytes  # double-buffered
    bb = max(8, (budget // max(per_row, 1)) // 8 * 8)
    bb = min(bb, max(8, _round_up(pl.cdiv(B, 2), 8)))    # >= 2 grid steps
    bb = min(bb, _round_up(B, 8))
    return bb


def seq_attn(query, key, weight, bias, *, block_b=None,
             vmem_limit_bytes=_DEFAULT_VMEM_LIMIT):
    """softmax(bmm(key, (query @ W.T + b)[..., None]).squeeze(-1), axis=-1)."""
    B, Q = query.shape
    _, S, K = key.shape

    # Host-side (free) prep: transpose the static Linear weight, 2-D bias.
    wt = jnp.transpose(weight)                 # (Q, K)
    b2 = bias.reshape(1, K)

    if block_b is None:
        block_b = _choose_block_b(B, S, K, key.dtype.itemsize, vmem_limit_bytes)
    grid = (pl.cdiv(B, block_b),)

    # Memory-bound cost model: traffic is dominated by the key stream.
    bytes_accessed = (key.size * key.dtype.itemsize
                      + query.size * query.dtype.itemsize
                      + weight.size * weight.dtype.itemsize
                      + bias.size * bias.dtype.itemsize
                      + B * S * 4)
    cost = pl.CostEstimate(flops=2 * B * S * K + 2 * B * Q * K,
                           transcendentals=B * S,
                           bytes_accessed=bytes_accessed)

    return pl.pallas_call(
        seq_attn_kernel,
        out_shape=jax.ShapeDtypeStruct((B, S), jnp.float32),
        grid=grid,
        in_specs=[
            pl.BlockSpec((block_b, Q), lambda i: (i, 0)),
            pl.BlockSpec((block_b, S, K), lambda i: (i, 0, 0)),
            pl.BlockSpec((Q, K), lambda i: (0, 0)),
            pl.BlockSpec((1, K), lambda i: (0, 0)),
        ],
        out_specs=pl.BlockSpec((block_b, S), lambda i: (i, 0)),
        compiler_params=pltpu.CompilerParams(
            dimension_semantics=("parallel",),
            vmem_limit_bytes=vmem_limit_bytes),
        cost_estimate=cost,
    )(query, key, wt, b2)


def seq_attn_ref(query, key, weight, bias):
    wq = query @ weight.T + bias.reshape(1, -1)        # (B, K)
    scores = jnp.einsum("bsk,bk->bs", key, wq)         # (B, S)
    return jax.nn.softmax(scores, axis=-1)


if __name__ == "__main__":
    B, Q, K, S = 2, 32, 32, 8

    root = jax.random.PRNGKey(0)
    kq, kk, kw, kb = jax.random.split(root, 4)

    query = jax.random.normal(kq, (B, Q), dtype=jnp.float32)
    key = jax.random.normal(kk, (B, S, K), dtype=jnp.float32)

    # Deterministic nn.Linear-style init: U(-1/sqrt(q_size), 1/sqrt(q_size)).
    bound = 1.0 / (Q ** 0.5)
    weight = jax.random.uniform(kw, (K, Q), jnp.float32, -bound, bound)
    bias = jax.random.uniform(kb, (K,), jnp.float32, -bound, bound)

    out = jax.block_until_ready(seq_attn(query, key, weight, bias))
    ref = seq_attn_ref(query, key, weight, bias)

    assert out.shape == (B, S)
    assert jnp.allclose(out, ref, atol=2e-4, rtol=2e-4), \
        float(jnp.max(jnp.abs(out - ref)))
    # Exact divide in the kernel => rows sum to 1 to float precision.
    assert jnp.allclose(jnp.sum(out, axis=-1), jnp.ones((B,)), atol=1e-4)

    print("KERNEL_OK")
</pallas_src>

<mosaic_0001>
module attributes {stable_mosaic.version = 11 : i64} {
  func.func @seq_attn_kernel(%arg0: i32, %arg1: memref<2x32xf32, #tpu.memory_space<vmem>>, %arg2: memref<2x8x32xf32, #tpu.memory_space<vmem>>, %arg3: memref<32x32xf32, #tpu.memory_space<vmem>>, %arg4: memref<1x32xf32, #tpu.memory_space<vmem>>, %arg5: memref<2x8xf32, #tpu.memory_space<vmem>>) attributes {dimension_semantics = [#tpu.dimension_semantics<parallel>], iteration_bounds = array<i64: 1>, scalar_prefetch = 0 : i64, scratch_operands = 0 : i64, tpu.core_type = #tpu.core_type<tc>, window_params = [{transform_indices = @transform_0, window_bounds = array<i64: 2, 32>}, {transform_indices = @transform_1, window_bounds = array<i64: 2, 8, 32>}, {pipeline_mode = #tpu.pipeline_mode<synchronous>, transform_indices = @transform_2, window_bounds = array<i64: 32, 32>}, {pipeline_mode = #tpu.pipeline_mode<synchronous>, transform_indices = @transform_3, window_bounds = array<i64: 1, 32>}, {transform_indices = @transform_4, window_bounds = array<i64: 2, 8>}]} {
    %c0 = arith.constant 0 : index
    %c0_0 = arith.constant 0 : index
    %0 = vector.load %arg1[%c0, %c0_0] : memref<2x32xf32, #tpu.memory_space<vmem>>, vector<2x32xf32>
    %c0_1 = arith.constant 0 : index
    %c0_2 = arith.constant 0 : index
    %1 = vector.load %arg3[%c0_1, %c0_2] : memref<32x32xf32, #tpu.memory_space<vmem>>, vector<32x32xf32>
    %cst = arith.constant dense<0.000000e+00> : vector<2x32xf32>
    %2 = tpu.matmul %0, %1, %cst {dimension_numbers = #tpu.dot_dimension_numbers<[1], [0], [0], [1], [0, 0, 1, 1], [], []>} : vector<2x32xf32>, vector<32x32xf32>, vector<2x32xf32> -> vector<2x32xf32>
    %c0_3 = arith.constant 0 : index
    %c0_4 = arith.constant 0 : index
    %3 = vector.load %arg4[%c0_3, %c0_4] : memref<1x32xf32, #tpu.memory_space<vmem>>, vector<1x32xf32>
    %4 = vector.broadcast %3 : vector<1x32xf32> to vector<2x32xf32>
    %5 = arith.addf %2, %4 : vector<2x32xf32>
    %6 = vector.shape_cast %5 : vector<2x32xf32> to vector<2x1x32xf32>
    %c0_5 = arith.constant 0 : index
    %c0_6 = arith.constant 0 : index
    %c0_7 = arith.constant 0 : index
    %7 = vector.load %arg2[%c0_5, %c0_6, %c0_7] : memref<2x8x32xf32, #tpu.memory_space<vmem>>, vector<2x8x32xf32>
    "tpu.trace_start"() <{level = 10 : i32, message = "bqk,bsk->bqs"}> : () -> ()
    %cst_8 = arith.constant dense<0.000000e+00> : vector<2x1x8xf32>
    %8 = tpu.matmul %6, %7, %cst_8 {dimension_numbers = #tpu.dot_dimension_numbers<[2], [2], [1], [1], [0, 0, 0, 1, 1, 1], [0], [0]>} : vector<2x1x32xf32>, vector<2x8x32xf32>, vector<2x1x8xf32> -> vector<2x1x8xf32>
    "tpu.trace_stop"() : () -> ()
    %9 = vector.shape_cast %8 : vector<2x1x8xf32> to vector<2x8xf32>
    %cst_9 = arith.constant dense<0xFF800000> : vector<2xf32>
    %10 = vector.multi_reduction <maximumf>, %9, %cst_9 [1] : vector<2x8xf32> to vector<2xf32>
    %11 = vector.shape_cast %10 : vector<2xf32> to vector<2x1xf32>
    %12 = vector.broadcast %11 : vector<2x1xf32> to vector<2x8xf32>
    %13 = arith.subf %9, %12 : vector<2x8xf32>
    %14 = math.exp %13 : vector<2x8xf32>
    %cst_10 = arith.constant dense<0.000000e+00> : vector<2xf32>
    %15 = vector.multi_reduction <add>, %14, %cst_10 [1] : vector<2x8xf32> to vector<2xf32>
    %16 = vector.shape_cast %15 : vector<2xf32> to vector<2x1xf32>
    %17 = vector.broadcast %16 : vector<2x1xf32> to vector<2x8xf32>
    %18 = arith.divf %14, %17 : vector<2x8xf32>
    %c0_11 = arith.constant 0 : index
    %c0_12 = arith.constant 0 : index
    %19 = vector.load %arg5[%c0_11, %c0_12] : memref<2x8xf32, #tpu.memory_space<vmem>>, vector<2x8xf32>
    tpu.vector_store %arg5[%c0_11, %c0_12], %18 {strides = array<i32>} : memref<2x8xf32, #tpu.memory_space<vmem>>, vector<2x8xf32>,
    return
  }
  func.func @transform_0(%arg0: i32) -> (i32, i32) {
    %c0_i32 = arith.constant 0 : i32
    %c0_i32_0 = arith.constant 0 : i32
    return %arg0, %c0_i32 : i32, i32
  }
  func.func @transform_1(%arg0: i32) -> (i32, i32, i32) {
    %c0_i32 = arith.constant 0 : i32
    %c0_i32_0 = arith.constant 0 : i32
    %c0_i32_1 = arith.constant 0 : i32
    return %arg0, %c0_i32, %c0_i32_0 : i32, i32, i32
  }
  func.func @transform_2(%arg0: i32) -> (i32, i32) {
    %c0_i32 = arith.constant 0 : i32
    %c0_i32_0 = arith.constant 0 : i32
    %c0_i32_1 = arith.constant 0 : i32
    return %c0_i32, %c0_i32_0 : i32, i32
  }
  func.func @transform_3(%arg0: i32) -> (i32, i32) {
    %c0_i32 = arith.constant 0 : i32
    %c0_i32_0 = arith.constant 0 : i32
    %c0_i32_1 = arith.constant 0 : i32
    return %c0_i32, %c0_i32_0 : i32, i32
  }
  func.func @transform_4(%arg0: i32) -> (i32, i32) {
    %c0_i32 = arith.constant 0 : i32
    %c0_i32_0 = arith.constant 0 : i32
    return %arg0, %c0_i32 : i32, i32
  }
}

</mosaic_0001>

<bundles_post_ra>
// kernel: tpu_custom_call.1
= control target key start
LH: loop header
LB: loop body
LE: loop exit
PB: predicated region body
PF: predicated region fallthrough
CT: control target
= control target key end

     0   :  { %9 = vsyncpa [#allocation3], 0  ;;  %s636_s0 = inlined_call_operand.hbm [shape: f32[2,32], index: 0, kind: input, shape index: {}]   ;;  %s637_s1 = inlined_call_operand.hbm [shape: f32[2,8,32], index: 1, kind: input, shape index: {}]   ;;  %s638_s2 = inlined_call_operand.hbm [shape: f32[32,32], index: 2, kind: input, shape index: {}]   ;;  %s639_s3 = inlined_call_operand.vmem [shape: f32[1,32], index: 3, kind: input, shape index: {}]   ;;  %s640_s4 = inlined_call_operand.hbm [shape: f32[2,8], index: 4, kind: output, shape index: {}]  }
   0x1   :  { %10 = vsyncpa [#allocation6], 0 }
   0x2   :  { %11 = vsyncpa [#allocation4], 0  ;;  %s530_s15 = smov [#allocation5]   ;;  %s436_s19 = scalar_lea.hbm %s637_s1, 256 }
   0x3   :  { %s27_s16 = sshll.u32 %s530_s15, 4  ;;  %p437_p0 = scmp.ne.s32.totalorder %s637_s1, %s436_s19  ;;  %s28_s16 = int_to_ptr.vmem [resolvable:$true] %s27_s16 }
   0x4   :  { %p440_p1 = scmp.lt.u32.totalorder %s436_s19, %s637_s1 }
   0x6   :  { %p442_p2 = pnand %p440_p1, %p437_p0 }
   0x8   :  { %445 = shalt.err (!%p442_p2)
}
   0x9   :  { %s446_s24 = scalar_lea.vmem %s28_s16, 256  ;;  %p451_p4 = scmp.lt.s32.totalorder %s28_s16, %s28_s16 }
   0xa   :  { %p447_p3 = scmp.ne.s32.totalorder %s28_s16, %s446_s24  ;;  %p452_p5 = scmp.lt.s32.totalorder %s446_s24, %s446_s24 }
   0xc   :  { %p453_p6 = por %p452_p5, %p451_p4 }
   0xe   :  { %p454_p7 = pnand %p453_p6, %p447_p3 }
  0x10   :  { %457 = shalt.err (!%p454_p7)
}
  0x11   :  { %s531_s25 = smov 128   ;;  %s532_s26 = smov 8  }
  0x12   :  { %33 = dma.hbm_to_vmem [thread:$0]  %s637_s1, 256, %s28_s16, [#allocation6], %s531_s25, %s531_s25, %s532_s26  }
  0x13   :  { %s533_s29 = smov [#allocation2]   ;;  %s534_s5 = smov [#allocation7]  }
  0x14   :  { %s18_s30 = sshll.u32 %s533_s29, 4  ;;  %s39_s6 = sshll.u32 %s534_s5, 4  ;;  %s19_s30 = int_to_ptr.vmem [resolvable:$true] %s18_s30  ;;  %s40_s6 = int_to_ptr.vmem [resolvable:$true] %s39_s6 }
  0x15   :  { %s458_s9 = scalar_lea.hbm %s636_s0, 32 }
  0x16   :  { %p459_p8 = scmp.ne.s32.totalorder %s636_s0, %s458_s9  ;;  %p462_p9 = scmp.lt.u32.totalorder %s458_s9, %s636_s0 }
  0x18   :  { %p464_p10 = pnand %p462_p9, %p459_p8 }
  0x1a   :  { %467 = shalt.err (!%p464_p10)
}
  0x1b   :  { %s468_s1 = scalar_lea.vmem %s19_s30, 32  ;;  %p473_p12 = scmp.lt.s32.totalorder %s19_s30, %s19_s30 }
  0x1c   :  { %p469_p11 = scmp.ne.s32.totalorder %s19_s30, %s468_s1  ;;  %p474_p13 = scmp.lt.s32.totalorder %s468_s1, %s468_s1 }
  0x1e   :  { %p475_p0 = por %p474_p13, %p473_p12 }
  0x20   :  { %p476_p1 = pnand %p475_p0, %p469_p11 }
  0x22   :  { %479 = shalt.err (!%p476_p1)
}
  0x23   :  { %21 = dma.hbm_to_vmem [thread:$0]  %s636_s0, 32, %s19_s30, [#allocation3]  }
  0x24   :  { %s480_s18 = scalar_lea.hbm %s638_s2, 512 }
  0x25   :  { %p481_p2 = scmp.ne.s32.totalorder %s638_s2, %s480_s18  ;;  %p484_p3 = scmp.lt.u32.totalorder %s480_s18, %s638_s2 }
  0x27   :  { %p486_p4 = pnand %p484_p3, %p481_p2 }
  0x29   :  { %489 = shalt.err (!%p486_p4)
}
  0x2a   :  { %s490_s23 = scalar_lea.vmem %s40_s6, 512  ;;  %p495_p6 = scmp.lt.s32.totalorder %s40_s6, %s40_s6 }
  0x2b   :  { %p491_p5 = scmp.ne.s32.totalorder %s40_s6, %s490_s23  ;;  %p496_p7 = scmp.lt.s32.totalorder %s490_s23, %s490_s23 }
  0x2d   :  { %p497_p8 = por %p496_p7, %p495_p6 }
  0x2f   :  { %p498_p9 = pnand %p497_p8, %p491_p5 }
  0x31   :  { %501 = shalt.err (!%p498_p9)
}
  0x32   :  { %45 = dma.hbm_to_vmem [thread:$0]  %s638_s2, 512, %s40_s6, [#allocation6], %s531_s25, %s531_s25, %s532_s26  }
  0x33   :  { %524 = dma.done.wait [#allocation3], 32  }
  0x34   :  { %525 = vsyncadd [#allocation3], 4294967264 }
  0x35   :  { %526 = dma.done.wait [#allocation6], 768  }
  0x36   :  { %527 = vsyncadd [#allocation6], 4294966528  ;;  %v535_v0 = vmov 0.0|0.0   ;;  %vm536_vm0 = vmmov 0   ;;  %v537_v1 = vmov 0.0   ;;  %v58_v2 = vld [vmem:[#allocation7] sm:$0xff]  ;;  %v147_v12 = vlaneseq }
  0x37   :  { %412 = vmatprep.subr.bf16.mxu0 %v535_v0  ;;  %399 = vmatprep.mubr.msk.f32.mxu0 %vm536_vm0, %v537_v1  ;;  %v59_v3 = vld [vmem:[#allocation7 + $0x8] sm:$0xff]  ;;  %v60_v4 = vld [vmem:[#allocation7 + $0x10] sm:$0xff]  ;;  %v61_v6 = vld [vmem:[#allocation7 + $0x18] sm:$0xff]  ;;  %vm69_vm1 = vcmask 261120   ;;  %v538_v10 = vmov 1966171168  }
  0x38   :  { %402 = vmatprep.subr.mxu1 %v537_v1  ;;  %404 = vmatprep.mubr.msk.f32.mxu1 %vm536_vm0, %v537_v1  ;;  %v413_v5 = vpack.c.bf16 %v59_v3, %v58_v2  ;;  %v416_v7 = vpack.c.bf16 %v61_v6, %v60_v4  ;;  %v57_v8 = vld [vmem:[#allocation2] sm:$0x3]  ;;  %v166_v9 = vld [vmem:[#allocation5] sm:$0xff]  ;;  %v145_v11 = vunpack.c.l.s4 %v538_v10  ;;  %v148_v14 = vshrl.u32 %v147_v12, 7  ;;  %v167_v23 = vld [vmem:[#allocation5 + $0x8] sm:$0xff] }
  0x39   :  { %403 = vmatpush3.xpose.msk.msra.mxu1 %vm69_vm1, %v166_v9  ;;  %v376_v15 = vld [vmem:[%s639_s3] ss:$0 sm:$0xff]  ;;  %vm321_vm2 = vcmask 1041409   ;;  %vm324_vm3 = vcmask 58368   ;;  %s539_s3 = smov [#allocation8]  }
  0x3a   :  { %414 = vmatpush3.bf16.msra.mxu0 %v413_v5  ;;  %407 = vmatprep.subr.mxu1 %v537_v1  ;;  %v146_v13 = vunpack.c.0.s8 %v145_v11  ;;  %s366_s26 = sshll.u32 %s539_s3, 4  ;;  %s367_s26 = int_to_ptr.vmem [resolvable:$true] %s366_s26 }
  0x3b   :  { %415 = vmatprep.subr.bf16.mxu0 %v535_v0  ;;  %s502_s27 = scalar_lea.vmem %s367_s26, 32  ;;  %p507_p11 = scmp.lt.s32.totalorder %s367_s26, %s367_s26 }
  0x3c   :  { %v149_v16 = vsub.s32 %v146_v13, %v148_v14  ;;  %p503_p10 = scmp.ne.s32.totalorder %s367_s26, %s502_s27  ;;  %p508_p12 = scmp.lt.s32.totalorder %s502_s27, %s502_s27 }
  0x3e   :  { %417 = vmatpush3.bf16.msra.mxu0 %v416_v7  ;;  %p509_p13 = por %p508_p12, %p507_p11 }
  0x40   :  { %p510_p0 = pnand %p509_p13, %p503_p10 }
  0x41   :  { %400 = vmatmul.mubr.msk.f32.vlgmr.msra.gmra.mrb[0].mxu0 %vm69_vm1, %v57_v8 }
 0x114   :  { %v139_v17 = vpop.f32.mrb[0].mxu0 }
 0x115   :  { %v140_v18 = vadd.f32 %v376_v15, %v139_v17  ;;  %v401_v19 = vpop.f32.mrb[1].mxu0 }
 0x117   :  { %v150_v20 = vrot.slane %v140_v18, %v149_v16 }
 0x119   :  { %v151_v21 = vcombine.high %v150_v20, %v150_v20  ;;  %v158_v22 = vrot.slane %v150_v20, %v149_v16 }
 0x11b   :  { %405 = vmatmul.mubr.msk.f32.vlgmr.msra.gmra.mrb[0].mxu1 %vm69_vm1, %v158_v22  ;;  %v165_v24 = vrot.slane %v151_v21, %v149_v16 }
 0x11c   :  { %408 = vmatpush3.xpose.msk.msra.mxu1 %vm69_vm1, %v167_v23  ;;  %409 = vmatprep.mubr.msk.f32.mxu1 %vm536_vm0, %v537_v1 }
 0x11f   :  { %410 = vmatmul.mubr.msk.f32.vlgmr.msra.gmra.mrb[2].mxu1 %vm69_vm1, %v165_v24 }
 0x1ee   :  { %v239_v25 = vpop.f32.mrb[0].mxu1 }
 0x1ef   :  { %v406_v26 = vpop.f32.mrb[1].mxu1 }
 0x1f2   :  { %v314_v27 = vpop.f32.mrb[2].mxu1 }
 0x1f3   :  { %v320_v28 = vrot.slane %v314_v27, 7  ;;  %v411_v29 = vpop.f32.mrb[3].mxu1 }
 0x1f5   :  { %v322_v30 = vsel %vm321_vm2, %v320_v28, %v239_v25 }
 0x1f6   :  { %v325_v31 = vsel %vm324_vm3, %v322_v30, -inf }
 0x1f7   :  { %326 = vmax.xlane.f32.xlu0 %v325_v31 }
 0x284   :  { %v327_v32 = vpop.xlane.xlu0 %326 }
 0x285   :  { %v329_v33 = vrot.slane %v327_v32, 1  ;;  %v332_v34 = vsub.f32 %v239_v25, %v327_v32 }
 0x287   :  { %v333_v35 = vsub.f32 %v314_v27, %v329_v33  ;;  %v334_v36 = vmul.f32 1.442695, %v332_v34 }
 0x289   :  { %v336_v37 = vmul.f32 1.442695, %v333_v35 }
 0x28b   :  { %428 = vpow2.f32 %v336_v37 }
 0x28c   :  { %430 = vpow2.f32 %v334_v36 }
 0x295   :  { %v429_v38 = vpop.eup %428 }
 0x296   :  { %v340_v39 = vrot.slane %v429_v38, 7  ;;  %v431_v40 = vpop.eup %430 }
 0x298   :  { %v341_v41 = vsel %vm321_vm2, %v340_v39, %v431_v40 }
 0x299   :  { %v343_v42 = vsel %vm324_vm3, %v341_v41, 0.0 }
 0x29a   :  { %344 = vadd.xlane.f32.xlu0 %v343_v42 }
 0x327   :  { %v345_v43 = vpop.xlane.xlu0 %344 }
 0x328   :  { %v347_v44 = vrot.slane %v345_v43, 1  ;;  %432 = vrcp.f32 %v345_v43 }
 0x32a   :  { %434 = vrcp.f32 %v347_v44 }
 0x332   :  { %v433_v45 = vpop.eup %432 }
 0x333   :  { %v351_v48 = vmul.f32 %v433_v45, %v431_v40 }
 0x334   :  { %v435_v46 = vpop.eup %434 }
 0x335   :  { %v353_v47 = vmul.f32 %v435_v46, %v429_v38 }
 0x337   :  { %v356_v49 = vrot.slane %v353_v47, 7 }
 0x339   :  { %v357_v50 = vsel %vm321_vm2, %v356_v49, %v351_v48 }
 0x33a   :  { %359 = vst.msk [vmem:[#allocation8] sm:$0x3] %vm324_vm3, %v357_v50 }
 0x33b   :  { %513 = shalt.err (!%p510_p0)
}
 0x33c   :  { %s514_s30 = scalar_lea.hbm %s640_s4, 32 }
 0x33d   :  { %p515_p1 = scmp.ne.s32.totalorder %s640_s4, %s514_s30  ;;  %p518_p2 = scmp.lt.u32.totalorder %s514_s30, %s640_s4 }
 0x33f   :  { %p520_p3 = pnand %p518_p2, %p515_p1 }
 0x341   :  { %523 = shalt.err (!%p520_p3)
}
 0x342   :  { %369 = dma.vmem_to_hbm [thread:$0]  %s367_s26, 32, %s640_s4, [#allocation4]  }
 0x343   :  { %528 = dma.done.wait [#allocation4], 32  }
 0x344   :  { %529 = vsyncadd [#allocation4], 4294967264 }
 0x345   :  { %373 = vsyncpa [#allocation3], 1 }
 0x346   :  { %374 = vsyncpa [#allocation6], 1 }
 0x347   :  { %375 = vsyncpa [#allocation4], 1 }

</bundles_post_ra>
